<compile_context>
chip_gen: v5e
topology: v5e:2x2
jax: 0.10.0
libtpu: 0.0.40
codegen_flags: <defaults>
</compile_context>

<pallas_src>
import math
import jax
import jax.numpy as jnp
from jax.experimental import pallas as pl
from jax.experimental.pallas import tpu as pltpu

# ---------------- model hyper-parameters (small, deterministic) ----------------
N = 2                            # batch
T = 16                           # sequence length
SIZE = 32                        # model size (input/output feature dim)  D
LINEAR_UNITS = 64                # hidden dim after channel_proj1         H
KERNEL_SIZES = (3, 5)            # "3,5"
N_CHANNELS = LINEAR_UNITS // 2   # 32                                     C
LN_EPS = 1e-12                   # espnet LayerNorm default eps
KMAX = max(KERNEL_SIZES)         # 5
MAX_PAD = (KMAX - 1) // 2        # 2

# ---------------- vector-slab row layout (shared by pack_params and the kernel) -------------
ROW_B1, ROW_LN_G, ROW_LN_B, ROW_CB, ROW_BL, ROW_B2, ROW_CW = 0, 1, 2, 3, 4, 5, 6
V_ROWS = ROW_CW + KMAX           # 11

_SQRT_2_OVER_PI = math.sqrt(2.0 / math.pi)


def _gelu(x):
    # tanh-approximate GELU (== torch.nn.GELU(approximate='tanh')).
    # Uses the EUP tanh slot instead of a long VALU erf polynomial.
    return 0.5 * x * (1.0 + jnp.tanh(_SQRT_2_OVER_PI * (x + 0.044715 * (x * x * x))))


# ---------------- Pallas kernel: whole batch in one invocation ----------------
def cgmlp_kernel(x_ref, w1_ref, wl_ref, w2_ref, v_ref, o_ref):
    C, D, H = N_CHANNELS, SIZE, LINEAR_UNITS
    C2 = 2 * C
    x = x_ref[...]                                   # (NT, D), batch+time flattened
    NT = x.shape[0]
    v = v_ref[...]                                   # (V_ROWS, H) consolidated small params

    b1   = v[ROW_B1:ROW_B1 + 1, :H]                  # (1, H)
    ln_g = v[ROW_LN_G:ROW_LN_G + 1, :C]              # (1, C)
    ln_b = v[ROW_LN_B:ROW_LN_B + 1, :C]
    cb   = v[ROW_CB:ROW_CB + 1, :C2]                 # (1, 2C)  [cb3 | cb5]
    bl   = v[ROW_BL:ROW_BL + 1, :C]
    b2   = v[ROW_B2:ROW_B2 + 1, :D]
    cw   = v[ROW_CW:ROW_CW + KMAX, :C2]              # (5, 2C)  [pad(cw3) | cw5]

    # channel_proj1: Linear(D -> H) + GELU; batch & time flattened into the matmul M dim
    h = jnp.dot(x, w1_ref[...], preferred_element_type=jnp.float32) + b1
    h = _gelu(h)                                     # (NT, H)

    x_r = h[:, :C]                                   # residual half
    x_i = h[:, C:]                                   # gated half

    # LayerNorm over the channel dim
    mu = jnp.mean(x_i, axis=-1, keepdims=True)
    xc = x_i - mu
    var = jnp.mean(xc * xc, axis=-1, keepdims=True)
    x_i = xc * jax.lax.rsqrt(var + LN_EPS) * ln_g + ln_b

    # Fused multi-kernel depthwise conv: duplicate the channels so the 3-tap branch
    # (zero-padded to 5 taps) and the 5-tap branch share the same vregs, shifted views,
    # boundary masks, tap FMAs and GELU pushes.  Per-row time masks keep taps inside each
    # batch element of the flattened (NT, 2C) layout ('same' zero padding along time).
    x2 = jnp.concatenate([x_i, x_i], axis=-1)                          # (NT, 2C)
    zeros_pad = jnp.zeros((MAX_PAD, C2), jnp.float32)
    xp = jnp.concatenate([zeros_pad, x2, zeros_pad], axis=0)           # (NT + 2*pad, 2C)
    t_idx = jax.lax.broadcasted_iota(jnp.int32, (NT, C2), 0) % T       # time within batch elem

    acc = jnp.broadcast_to(cb, (NT, C2))             # conv bias folded into accumulator init
    for j in range(KMAX):                            # static taps, offset o = j - MAX_PAD
        o = j - MAX_PAD
        if o == 0:
            s = x2
        else:
            s = xp[MAX_PAD + o:MAX_PAD + o + NT, :]
            if o < 0:                                # one-sided boundary mask
                s = jnp.where(t_idx + o >= 0, s, 0.0)
            else:
                s = jnp.where(t_idx + o < T, s, 0.0)
        acc = acc + cw[j:j + 1, :] * s

    # arch_type == 'sum' with use_non_linear=True -> activation per branch, then sum
    y = _gelu(acc)                                                     # (NT, 2C)
    x_g = y[:, :C] + y[:, C:]                                          # (NT, C)

    # use_linear_after_conv=True
    x_g = jnp.dot(x_g, wl_ref[...], preferred_element_type=jnp.float32) + bl

    # gate_activation == 'identity'; dropout_rate=0 (inference) -> identity
    gated = x_r * x_g                                                  # (NT, C)

    # channel_proj2: Linear(C -> D); one lane-contiguous store for the whole batch
    out = jnp.dot(gated, w2_ref[...], preferred_element_type=jnp.float32) + b2
    o_ref[...] = out.astype(o_ref.dtype)


# ---------------- parameter consolidation ----------------
def pack_params(p):
    """Pack the 10 small vectors / conv weights into one (V_ROWS, H) slab."""
    C, D, H = N_CHANNELS, SIZE, LINEAR_UNITS
    C2 = 2 * C
    assert H >= C2 and H >= D
    v = jnp.zeros((V_ROWS, H), jnp.float32)
    v = v.at[ROW_B1, :H].set(p["b1"])
    v = v.at[ROW_LN_G, :C].set(p["ln_g"])
    v = v.at[ROW_LN_B, :C].set(p["ln_b"])
    v = v.at[ROW_CB, :C].set(p["cb3"])
    v = v.at[ROW_CB, C:C2].set(p["cb5"])
    v = v.at[ROW_BL, :C].set(p["bl"])
    v = v.at[ROW_B2, :D].set(p["b2"])
    # conv weight slab (5, 2C): group 0 = 3-tap weights center-aligned in 5 taps, group 1 = 5-tap
    v = v.at[ROW_CW + 1:ROW_CW + 4, :C].set(p["cw3"])
    v = v.at[ROW_CW:ROW_CW + KMAX, C:C2].set(p["cw5"])
    return p["w1"], p["wl"], p["w2"], v


# ---------------- wrapper ----------------
def multiconv_cgmlp(x, params):
    Nb, T_, D = x.shape
    H, C = LINEAR_UNITS, N_CHANNELS
    NT = Nb * T_
    w1, wl, w2, vslab = pack_params(params)
    x2d = x.reshape(NT, D)                           # flatten batch+time (contiguous, free)

    flops = (2 * NT * (D * H + C * C + C * D)        # three projections
             + 2 * NT * 2 * C * KMAX                 # fused depthwise conv taps
             + 20 * NT * H)                          # LN / GELU polys / gating elementwise
    transcendentals = NT * H + NT * 2 * C + NT       # tanh for the GELUs + rsqrt
    bytes_accessed = 4 * (x2d.size + w1.size + wl.size + w2.size + vslab.size + NT * D)

    vmem_spec = pl.BlockSpec(memory_space=pltpu.MemorySpace.VMEM)
    out2d = pl.pallas_call(
        cgmlp_kernel,
        out_shape=jax.ShapeDtypeStruct((NT, D), jnp.float32),
        in_specs=[vmem_spec] * 5,
        out_specs=vmem_spec,
        cost_estimate=pl.CostEstimate(flops=flops,
                                      transcendentals=transcendentals,
                                      bytes_accessed=bytes_accessed),
    )(x2d, w1, wl, w2, vslab)
    return out2d.reshape(Nb, T_, D)


# ---------------- pure-JAX reference (same math, no Pallas) ----------------
def reference(x, p):
    C = N_CHANNELS
    h = _gelu(x @ p["w1"] + p["b1"])
    x_r, x_i = h[..., :C], h[..., C:]
    mu = jnp.mean(x_i, axis=-1, keepdims=True)
    var = jnp.mean((x_i - mu) ** 2, axis=-1, keepdims=True)
    x_i = (x_i - mu) * jax.lax.rsqrt(var + LN_EPS) * p["ln_g"] + p["ln_b"]

    def dwconv(xin, w, b, k):
        T_ = xin.shape[1]
        pad = (k - 1) // 2
        xp = jnp.pad(xin, ((0, 0), (pad, pad), (0, 0)))
        acc = jnp.zeros_like(xin) + b
        for j in range(k):
            acc = acc + w[j] * xp[:, j:j + T_, :]
        return acc

    y3 = _gelu(dwconv(x_i, p["cw3"], p["cb3"], 3))
    y5 = _gelu(dwconv(x_i, p["cw5"], p["cb5"], 5))
    x_g = (y3 + y5) @ p["wl"] + p["bl"]
    gated = x_r * x_g
    return gated @ p["w2"] + p["b2"]


# ---------------- deterministic parameter init ----------------
def init_params(key):
    D, H, C = SIZE, LINEAR_UNITS, N_CHANNELS
    ks = jax.random.split(key, 10)
    u = lambda k, shape, s: (jax.random.uniform(k, shape, jnp.float32) - 0.5) * 2.0 * s
    return {
        "w1": u(ks[0], (D, H), 1.0 / math.sqrt(D)),
        "b1": u(ks[1], (H,), 0.1),
        "ln_g": jnp.ones((C,), jnp.float32),
        "ln_b": jnp.zeros((C,), jnp.float32),
        # depthwise conv weights: (k, C) where [j, c] == torch weight[c, 0, j]
        "cw3": u(ks[2], (3, C), 0.5),
        "cb3": u(ks[3], (C,), 0.1),
        "cw5": u(ks[4], (5, C), 0.5),
        "cb5": u(ks[5], (C,), 0.1),
        "wl": u(ks[6], (C, C), 1.0 / math.sqrt(C)),
        "bl": u(ks[7], (C,), 0.1),
        "w2": u(ks[8], (C, D), 1.0 / math.sqrt(C)),
        "b2": u(ks[9], (D,), 0.1),
    }


if __name__ == "__main__":
    key = jax.random.PRNGKey(0)
    kp, kx = jax.random.split(key)
    params = init_params(kp)
    x = jax.random.normal(kx, (N, T, SIZE), jnp.float32)

    out = jax.block_until_ready(multiconv_cgmlp(x, params))
    ref = reference(x, params)

    assert out.shape == (N, T, SIZE)
    assert jnp.allclose(out, ref, atol=1e-4, rtol=1e-4), "mismatch vs JAX reference"

    # TODO(synk): dropout is treated as inference-mode identity (dropout_rate=0); no RNG dropout
    #             in-kernel. Activation is GELU(approximate='tanh'); only arch_type='sum' path.
    print("KERNEL_OK")
</pallas_src>

<mosaic_0001>
module attributes {stable_mosaic.version = 11 : i64} {
  func.func @cgmlp_kernel(%arg0: memref<32x32xf32, #tpu.memory_space<vmem>>, %arg1: memref<32x64xf32, #tpu.memory_space<vmem>>, %arg2: memref<32x32xf32, #tpu.memory_space<vmem>>, %arg3: memref<32x32xf32, #tpu.memory_space<vmem>>, %arg4: memref<11x64xf32, #tpu.memory_space<vmem>>, %arg5: memref<32x32xf32, #tpu.memory_space<vmem>>) attributes {dimension_semantics = [], scalar_prefetch = 0 : i64, scratch_operands = 0 : i64, tpu.core_type = #tpu.core_type<tc>} {
    %c0 = arith.constant 0 : index
    %c0_0 = arith.constant 0 : index
    %0 = vector.load %arg0[%c0, %c0_0] : memref<32x32xf32, #tpu.memory_space<vmem>>, vector<32x32xf32>
    %c0_1 = arith.constant 0 : index
    %c0_2 = arith.constant 0 : index
    %1 = vector.load %arg4[%c0_1, %c0_2] : memref<11x64xf32, #tpu.memory_space<vmem>>, vector<11x64xf32>
    %2 = vector.extract_strided_slice %1 {offsets = [0, 0], sizes = [1, 64], strides = [1, 1]} : vector<11x64xf32> to vector<1x64xf32>
    %3 = vector.extract_strided_slice %1 {offsets = [1, 0], sizes = [1, 32], strides = [1, 1]} : vector<11x64xf32> to vector<1x32xf32>
    %4 = vector.extract_strided_slice %1 {offsets = [2, 0], sizes = [1, 32], strides = [1, 1]} : vector<11x64xf32> to vector<1x32xf32>
    %5 = vector.extract_strided_slice %1 {offsets = [3, 0], sizes = [1, 64], strides = [1, 1]} : vector<11x64xf32> to vector<1x64xf32>
    %6 = vector.extract_strided_slice %1 {offsets = [4, 0], sizes = [1, 32], strides = [1, 1]} : vector<11x64xf32> to vector<1x32xf32>
    %7 = vector.extract_strided_slice %1 {offsets = [5, 0], sizes = [1, 32], strides = [1, 1]} : vector<11x64xf32> to vector<1x32xf32>
    %8 = vector.extract_strided_slice %1 {offsets = [6, 0], sizes = [5, 64], strides = [1, 1]} : vector<11x64xf32> to vector<5x64xf32>
    %c0_3 = arith.constant 0 : index
    %c0_4 = arith.constant 0 : index
    %9 = vector.load %arg1[%c0_3, %c0_4] : memref<32x64xf32, #tpu.memory_space<vmem>>, vector<32x64xf32>
    %cst = arith.constant dense<0.000000e+00> : vector<32x64xf32>
    %10 = tpu.matmul %0, %9, %cst {dimension_numbers = #tpu.dot_dimension_numbers<[1], [0], [0], [1], [0, 0, 1, 1], [], []>} : vector<32x32xf32>, vector<32x64xf32>, vector<32x64xf32> -> vector<32x64xf32>
    %11 = vector.broadcast %2 : vector<1x64xf32> to vector<32x64xf32>
    %12 = arith.addf %10, %11 : vector<32x64xf32>
    %cst_5 = arith.constant 5.000000e-01 : f32
    %13 = vector.broadcast %cst_5 : f32 to vector<32x64xf32>
    %14 = arith.mulf %13, %12 : vector<32x64xf32>
    %15 = arith.mulf %12, %12 : vector<32x64xf32>
    %16 = arith.mulf %15, %12 : vector<32x64xf32>
    %cst_6 = arith.constant 4.471500e-02 : f32
    %17 = vector.broadcast %cst_6 : f32 to vector<32x64xf32>
    %18 = arith.mulf %17, %16 : vector<32x64xf32>
    %19 = arith.addf %12, %18 : vector<32x64xf32>
    %cst_7 = arith.constant 0.797884583 : f32
    %20 = vector.broadcast %cst_7 : f32 to vector<32x64xf32>
    %21 = arith.mulf %20, %19 : vector<32x64xf32>
    %22 = math.tanh %21 : vector<32x64xf32>
    %cst_8 = arith.constant 1.000000e+00 : f32
    %23 = vector.broadcast %cst_8 : f32 to vector<32x64xf32>
    %24 = arith.addf %23, %22 : vector<32x64xf32>
    %25 = arith.mulf %14, %24 : vector<32x64xf32>
    %26 = vector.extract_strided_slice %25 {offsets = [0, 0], sizes = [32, 32], strides = [1, 1]} : vector<32x64xf32> to vector<32x32xf32>
    %27 = vector.extract_strided_slice %25 {offsets = [0, 32], sizes = [32, 32], strides = [1, 1]} : vector<32x64xf32> to vector<32x32xf32>
    %cst_9 = arith.constant dense<0.000000e+00> : vector<32xf32>
    %28 = vector.multi_reduction <add>, %27, %cst_9 [1] : vector<32x32xf32> to vector<32xf32>
    %29 = vector.shape_cast %28 : vector<32xf32> to vector<32x1xf32>
    %cst_10 = arith.constant 3.200000e+01 : f32
    %30 = vector.broadcast %cst_10 : f32 to vector<32x1xf32>
    %31 = arith.divf %29, %30 : vector<32x1xf32>
    %32 = vector.broadcast %31 : vector<32x1xf32> to vector<32x32xf32>
    %33 = arith.subf %27, %32 : vector<32x32xf32>
    %34 = arith.mulf %33, %33 : vector<32x32xf32>
    %cst_11 = arith.constant dense<0.000000e+00> : vector<32xf32>
    %35 = vector.multi_reduction <add>, %34, %cst_11 [1] : vector<32x32xf32> to vector<32xf32>
    %36 = vector.shape_cast %35 : vector<32xf32> to vector<32x1xf32>
    %cst_12 = arith.constant 3.200000e+01 : f32
    %37 = vector.broadcast %cst_12 : f32 to vector<32x1xf32>
    %38 = arith.divf %36, %37 : vector<32x1xf32>
    %cst_13 = arith.constant 9.99999996E-13 : f32
    %39 = vector.broadcast %cst_13 : f32 to vector<32x1xf32>
    %40 = arith.addf %38, %39 : vector<32x1xf32>
    %41 = math.rsqrt %40 : vector<32x1xf32>
    %42 = vector.broadcast %41 : vector<32x1xf32> to vector<32x32xf32>
    %43 = arith.mulf %33, %42 : vector<32x32xf32>
    %44 = vector.broadcast %3 : vector<1x32xf32> to vector<32x32xf32>
    %45 = arith.mulf %43, %44 : vector<32x32xf32>
    %46 = vector.broadcast %4 : vector<1x32xf32> to vector<32x32xf32>
    %47 = arith.addf %45, %46 : vector<32x32xf32>
    %48 = tpu.concatenate %47, %47 in 1 : vector<32x32xf32>, vector<32x32xf32> -> vector<32x64xf32>
    %cst_14 = arith.constant 0.000000e+00 : f32
    %49 = vector.broadcast %cst_14 : f32 to vector<2x64xf32>
    %50 = tpu.concatenate %49, %48, %49 in 0 : vector<2x64xf32>, vector<32x64xf32>, vector<2x64xf32> -> vector<36x64xf32>
    %51 = tpu.iota {dimensions = array<i32: 0>} : vector<32x64xi32>
    %c16_i32 = arith.constant 16 : i32
    %c0_i32 = arith.constant 0 : i32
    %52 = arith.cmpi eq, %c16_i32, %c0_i32 : i32
    %c1_i32 = arith.constant 1 : i32
    %53 = arith.select %52, %c1_i32, %c16_i32 : i32
    %54 = vector.broadcast %53 : i32 to vector<32x64xi32>
    %55 = arith.remsi %51, %54 : vector<32x64xi32>
    %c0_i32_15 = arith.constant 0 : i32
    %56 = vector.broadcast %c0_i32_15 : i32 to vector<32x64xi32>
    %57 = arith.cmpi ne, %55, %56 : vector<32x64xi32>
    %c0_i32_16 = arith.constant 0 : i32
    %58 = vector.broadcast %c0_i32_16 : i32 to vector<32x64xi32>
    %59 = arith.cmpi slt, %55, %58 : vector<32x64xi32>
    %c0_i32_17 = arith.constant 0 : i32
    %60 = arith.cmpi slt, %53, %c0_i32_17 : i32
    %61 = vector.broadcast %60 : i1 to vector<32x64xi1>
    %62 = vector.broadcast %61 : vector<32x64xi1> to vector<32x64xi1>
    %63 = arith.xori %59, %62 : vector<32x64xi1>
    %64 = arith.andi %63, %57 : vector<32x64xi1>
    %65 = vector.broadcast %53 : i32 to vector<32x64xi32>
    %66 = arith.addi %55, %65 : vector<32x64xi32>
    %67 = arith.select %64, %66, %55 : vector<32x64xi1>, vector<32x64xi32>
    %68 = vector.shape_cast %5 : vector<1x64xf32> to vector<1x64xf32>
    %69 = vector.broadcast %68 : vector<1x64xf32> to vector<32x64xf32>
    %70 = vector.extract_strided_slice %50 {offsets = [0, 0], sizes = [32, 64], strides = [1, 1]} : vector<36x64xf32> to vector<32x64xf32>
    %c-2_i32 = arith.constant -2 : i32
    %71 = vector.broadcast %c-2_i32 : i32 to vector<32x64xi32>
    %72 = arith.addi %67, %71 : vector<32x64xi32>
    %c0_i32_18 = arith.constant 0 : i32
    %73 = vector.broadcast %c0_i32_18 : i32 to vector<32x64xi32>
    %74 = arith.cmpi sge, %72, %73 : vector<32x64xi32>
    %cst_19 = arith.constant 0.000000e+00 : f32
    %75 = vector.broadcast %cst_19 : f32 to vector<32x64xf32>
    %76 = arith.select %74, %70, %75 : vector<32x64xi1>, vector<32x64xf32>
    %77 = vector.extract_strided_slice %8 {offsets = [0, 0], sizes = [1, 64], strides = [1, 1]} : vector<5x64xf32> to vector<1x64xf32>
    %78 = vector.broadcast %77 : vector<1x64xf32> to vector<32x64xf32>
    %79 = arith.mulf %78, %76 : vector<32x64xf32>
    %80 = arith.addf %69, %79 : vector<32x64xf32>
    %81 = vector.extract_strided_slice %50 {offsets = [1, 0], sizes = [32, 64], strides = [1, 1]} : vector<36x64xf32> to vector<32x64xf32>
    %c-1_i32 = arith.constant -1 : i32
    %82 = vector.broadcast %c-1_i32 : i32 to vector<32x64xi32>
    %83 = arith.addi %67, %82 : vector<32x64xi32>
    %c0_i32_20 = arith.constant 0 : i32
    %84 = vector.broadcast %c0_i32_20 : i32 to vector<32x64xi32>
    %85 = arith.cmpi sge, %83, %84 : vector<32x64xi32>
    %cst_21 = arith.constant 0.000000e+00 : f32
    %86 = vector.broadcast %cst_21 : f32 to vector<32x64xf32>
    %87 = arith.select %85, %81, %86 : vector<32x64xi1>, vector<32x64xf32>
    %88 = vector.extract_strided_slice %8 {offsets = [1, 0], sizes = [1, 64], strides = [1, 1]} : vector<5x64xf32> to vector<1x64xf32>
    %89 = vector.broadcast %88 : vector<1x64xf32> to vector<32x64xf32>
    %90 = arith.mulf %89, %87 : vector<32x64xf32>
    %91 = arith.addf %80, %90 : vector<32x64xf32>
    %92 = vector.extract_strided_slice %8 {offsets = [2, 0], sizes = [1, 64], strides = [1, 1]} : vector<5x64xf32> to vector<1x64xf32>
    %93 = vector.broadcast %92 : vector<1x64xf32> to vector<32x64xf32>
    %94 = arith.mulf %93, %48 : vector<32x64xf32>
    %95 = arith.addf %91, %94 : vector<32x64xf32>
    %96 = vector.extract_strided_slice %50 {offsets = [3, 0], sizes = [32, 64], strides = [1, 1]} : vector<36x64xf32> to vector<32x64xf32>
    %c1_i32_22 = arith.constant 1 : i32
    %97 = vector.broadcast %c1_i32_22 : i32 to vector<32x64xi32>
    %98 = arith.addi %67, %97 : vector<32x64xi32>
    %c16_i32_23 = arith.constant 16 : i32
    %99 = vector.broadcast %c16_i32_23 : i32 to vector<32x64xi32>
    %100 = arith.cmpi slt, %98, %99 : vector<32x64xi32>
    %cst_24 = arith.constant 0.000000e+00 : f32
    %101 = vector.broadcast %cst_24 : f32 to vector<32x64xf32>
    %102 = arith.select %100, %96, %101 : vector<32x64xi1>, vector<32x64xf32>
    %103 = vector.extract_strided_slice %8 {offsets = [3, 0], sizes = [1, 64], strides = [1, 1]} : vector<5x64xf32> to vector<1x64xf32>
    %104 = vector.broadcast %103 : vector<1x64xf32> to vector<32x64xf32>
    %105 = arith.mulf %104, %102 : vector<32x64xf32>
    %106 = arith.addf %95, %105 : vector<32x64xf32>
    %107 = vector.extract_strided_slice %50 {offsets = [4, 0], sizes = [32, 64], strides = [1, 1]} : vector<36x64xf32> to vector<32x64xf32>
    %c2_i32 = arith.constant 2 : i32
    %108 = vector.broadcast %c2_i32 : i32 to vector<32x64xi32>
    %109 = arith.addi %67, %108 : vector<32x64xi32>
    %c16_i32_25 = arith.constant 16 : i32
    %110 = vector.broadcast %c16_i32_25 : i32 to vector<32x64xi32>
    %111 = arith.cmpi slt, %109, %110 : vector<32x64xi32>
    %cst_26 = arith.constant 0.000000e+00 : f32
    %112 = vector.broadcast %cst_26 : f32 to vector<32x64xf32>
    %113 = arith.select %111, %107, %112 : vector<32x64xi1>, vector<32x64xf32>
    %114 = vector.extract_strided_slice %8 {offsets = [4, 0], sizes = [1, 64], strides = [1, 1]} : vector<5x64xf32> to vector<1x64xf32>
    %115 = vector.broadcast %114 : vector<1x64xf32> to vector<32x64xf32>
    %116 = arith.mulf %115, %113 : vector<32x64xf32>
    %117 = arith.addf %106, %116 : vector<32x64xf32>
    %cst_27 = arith.constant 5.000000e-01 : f32
    %118 = vector.broadcast %cst_27 : f32 to vector<32x64xf32>
    %119 = arith.mulf %118, %117 : vector<32x64xf32>
    %120 = arith.mulf %117, %117 : vector<32x64xf32>
    %121 = arith.mulf %120, %117 : vector<32x64xf32>
    %cst_28 = arith.constant 4.471500e-02 : f32
    %122 = vector.broadcast %cst_28 : f32 to vector<32x64xf32>
    %123 = arith.mulf %122, %121 : vector<32x64xf32>
    %124 = arith.addf %117, %123 : vector<32x64xf32>
    %cst_29 = arith.constant 0.797884583 : f32
    %125 = vector.broadcast %cst_29 : f32 to vector<32x64xf32>
    %126 = arith.mulf %125, %124 : vector<32x64xf32>
    %127 = math.tanh %126 : vector<32x64xf32>
    %cst_30 = arith.constant 1.000000e+00 : f32
    %128 = vector.broadcast %cst_30 : f32 to vector<32x64xf32>
    %129 = arith.addf %128, %127 : vector<32x64xf32>
    %130 = arith.mulf %119, %129 : vector<32x64xf32>
    %131 = vector.extract_strided_slice %130 {offsets = [0, 0], sizes = [32, 32], strides = [1, 1]} : vector<32x64xf32> to vector<32x32xf32>
    %132 = vector.extract_strided_slice %130 {offsets = [0, 32], sizes = [32, 32], strides = [1, 1]} : vector<32x64xf32> to vector<32x32xf32>
    %133 = arith.addf %131, %132 : vector<32x32xf32>
    %c0_31 = arith.constant 0 : index
    %c0_32 = arith.constant 0 : index
    %134 = vector.load %arg2[%c0_31, %c0_32] : memref<32x32xf32, #tpu.memory_space<vmem>>, vector<32x32xf32>
    %cst_33 = arith.constant dense<0.000000e+00> : vector<32x32xf32>
    %135 = tpu.matmul %133, %134, %cst_33 {dimension_numbers = #tpu.dot_dimension_numbers<[1], [0], [0], [1], [0, 0, 1, 1], [], []>} : vector<32x32xf32>, vector<32x32xf32>, vector<32x32xf32> -> vector<32x32xf32>
    %136 = vector.broadcast %6 : vector<1x32xf32> to vector<32x32xf32>
    %137 = arith.addf %135, %136 : vector<32x32xf32>
    %138 = arith.mulf %26, %137 : vector<32x32xf32>
    %c0_34 = arith.constant 0 : index
    %c0_35 = arith.constant 0 : index
    %139 = vector.load %arg3[%c0_34, %c0_35] : memref<32x32xf32, #tpu.memory_space<vmem>>, vector<32x32xf32>
    %cst_36 = arith.constant dense<0.000000e+00> : vector<32x32xf32>
    %140 = tpu.matmul %138, %139, %cst_36 {dimension_numbers = #tpu.dot_dimension_numbers<[1], [0], [0], [1], [0, 0, 1, 1], [], []>} : vector<32x32xf32>, vector<32x32xf32>, vector<32x32xf32> -> vector<32x32xf32>
    %141 = vector.broadcast %7 : vector<1x32xf32> to vector<32x32xf32>
    %142 = arith.addf %140, %141 : vector<32x32xf32>
    %c0_37 = arith.constant 0 : index
    %c0_38 = arith.constant 0 : index
    %143 = vector.load %arg5[%c0_37, %c0_38] : memref<32x32xf32, #tpu.memory_space<vmem>>, vector<32x32xf32>
    tpu.vector_store %arg5[%c0_37, %c0_38], %142 {strides = array<i32>} : memref<32x32xf32, #tpu.memory_space<vmem>>, vector<32x32xf32>,
    return
  }
}

</mosaic_0001>

<bundles_post_ra>
// kernel: tpu_custom_call.1
= control target key start
LH: loop header
LB: loop body
LE: loop exit
PB: predicated region body
PF: predicated region fallthrough
CT: control target
= control target key end

     0   :  { %10 = vsyncpa [#allocation3], 0  ;;  %s1217_s0 = inlined_call_operand.hbm [shape: f32[32,32], index: 0, kind: input, shape index: {}]   ;;  %s1218_s1 = inlined_call_operand.hbm [shape: f32[32,64], index: 1, kind: input, shape index: {}]   ;;  %s1219_s2 = inlined_call_operand.hbm [shape: f32[32,32], index: 2, kind: input, shape index: {}]   ;;  %s1220_s3 = inlined_call_operand.hbm [shape: f32[32,32], index: 3, kind: input, shape index: {}]   ;;  %s1221_s4 = inlined_call_operand.hbm [shape: f32[11,64], index: 4, kind: input, shape index: {}]   ;;  %s1222_s5 = inlined_call_operand.hbm [shape: f32[32,32], index: 5, kind: output, shape index: {}]  }
   0x1   :  { %11 = vsyncpa [#allocation6], 0 }
   0x2   :  { %12 = vsyncpa [#allocation9], 0 }
   0x3   :  { %13 = vsyncpa [#allocation4], 0  ;;  %s31_s20 = sshll.u32 %s1218_s1, 4  ;;  %s953_s21 = smov [#allocation5]   ;;  %s32_s20 = int_to_ptr.hbm [resolvable:$true] %s31_s20 }
   0x4   :  { %s33_s22 = sshll.u32 %s953_s21, 4  ;;  %s57_s25 = sshll.u32 %s1220_s3, 4  ;;  %s34_s22 = int_to_ptr.vmem [resolvable:$true] %s33_s22  ;;  %s58_s25 = int_to_ptr.hbm [resolvable:$true] %s57_s25 }
   0x5   :  { %s954_s26 = smov 128   ;;  %s955_s27 = smov 8  }
   0x6   :  { %39 = dma.hbm_to_vmem [thread:$0]  %s32_s20, 512, %s34_s22, [#allocation6], %s954_s26, %s954_s26, %s955_s27  }
   0x7   :  { %s956_s28 = smov [#allocation8]   ;;  %s18_s1 = sshll.u32 %s1217_s0, 4  ;;  %s19_s1 = int_to_ptr.hbm [resolvable:$true] %s18_s1 }
   0x8   :  { %s59_s29 = sshll.u32 %s956_s28, 4  ;;  %s44_s8 = sshll.u32 %s1219_s2, 4  ;;  %s60_s29 = int_to_ptr.vmem [resolvable:$true] %s59_s29  ;;  %s45_s8 = int_to_ptr.hbm [resolvable:$true] %s44_s8 }
   0x9   :  { %65 = dma.hbm_to_vmem [thread:$0]  %s58_s25, 512, %s60_s29, [#allocation9], %s954_s26, %s954_s26, %s955_s27  }
   0xa   :  { %s957_s9 = smov [#allocation2]   ;;  %s958_s11 = smov [#allocation7]  }
   0xb   :  { %s20_s10 = sshll.u32 %s957_s9, 4  ;;  %s46_s0 = sshll.u32 %s958_s11, 4  ;;  %s21_s10 = int_to_ptr.vmem [resolvable:$true] %s20_s10  ;;  %s47_s0 = int_to_ptr.vmem [resolvable:$true] %s46_s0 }
   0xc   :  { %26 = dma.hbm_to_vmem [thread:$0]  %s19_s1, 512, %s21_s10, [#allocation3], %s954_s26, %s954_s26, %s955_s27  }
   0xd   :  { %s70_s14 = sshll.u32 %s1221_s4, 4  ;;  %s959_s2 = smov [#allocation10]   ;;  %s71_s14 = int_to_ptr.hbm [resolvable:$true] %s70_s14 }
   0xe   :  { %52 = dma.hbm_to_vmem [thread:$0]  %s45_s8, 512, %s47_s0, [#allocation6], %s954_s26, %s954_s26, %s955_s27  }
   0xf   :  { %s72_s15 = sshll.u32 %s959_s2, 4  ;;  %s73_s15 = int_to_ptr.vmem [resolvable:$true] %s72_s15 }
  0x10   :  { %78 = dma.hbm_to_vmem [thread:$0]  %s71_s14, 256, %s73_s15, [#allocation9], %s954_s26, %s954_s26, %s955_s27  }
  0x11   :  { %945 = dma.done.wait [#allocation3], 512  }
  0x12   :  { %946 = vsyncadd [#allocation3], 4294966784 }
  0x13   :  { %947 = dma.done.wait [#allocation6], 1024  }
  0x14   :  { %948 = vsyncadd [#allocation6], 4294966272 }
  0x15   :  { %949 = dma.done.wait [#allocation9], 768  }
  0x16   :  { %950 = vsyncadd [#allocation9], 4294966528  ;;  %v108_v0 = vld [vmem:[#allocation5 + $0x18] sm:$0xff]  ;;  %v107_v1 = vld [vmem:[#allocation5 + $0x10] sm:$0xff]  ;;  %vm110_vm0 = vcmask 261120   ;;  %s960_s4 = smov 96  }
  0x17   :  { %135 = vmatpush.msra.mxu0 %v108_v0  ;;  %752 = vmatpush.msra.mxu3 %v108_v0  ;;  %v106_v2 = vld [vmem:[#allocation5 + $0x8] sm:$0xff]  ;;  %v105_v3 = vld [vmem:[#allocation5] sm:$0xff]  ;;  %v101_v6 = vld [vmem:[#allocation2 + $0x10] sm:$0xff]  ;;  %v961_v62 = vmov 32.0   ;;  %s962_s16 = smov 32   ;;  %vm357_vm14 = vcmask 1041408  }
  0x18   :  { %v99_v4 = vld [vmem:[#allocation2] sm:$0xff]  ;;  %v100_v5 = vld [vmem:[#allocation2 + $0x8] sm:$0xff]  ;;  %v102_v7 = vld [vmem:[#allocation2 + $0x18] sm:$0xff]  ;;  %vm457_vm15 = vcmask 1046528   ;;  %s963_s17 = smov [#allocation11]   ;;  %s725_s21 = sshll.u32 %s1222_s5, 4  ;;  %s726_s21 = int_to_ptr.hbm [resolvable:$true] %s725_s21 }
  0x19   :  { %136 = vmatpush.msra.mxu0 %v107_v1  ;;  %753 = vmatpush.msra.mxu3 %v107_v1  ;;  %v1028_v8 = vld [vmem:[#allocation10] sm:$0xff]  ;;  %s723_s18 = sshll.u32 %s963_s17, 4  ;;  %s724_s18 = int_to_ptr.vmem [resolvable:$true] %s723_s18 }
  0x1a   :  { %v109_v9 = vperm.slane %v1028_v8, 0 }
  0x1b   :  { %137 = vmatpush.msra.mxu0 %v106_v2  ;;  %754 = vmatpush.msra.mxu3 %v106_v2 }
  0x1d   :  { %138 = vmatpush.msra.mxu0 %v105_v3  ;;  %755 = vmatpush.msra.mxu3 %v105_v3 }
  0x1e   :  { %740 = vmatmul.msk.f32.vlgmr.msra.gmra.mxu0 %vm110_vm0, %v99_v4  ;;  %741 = vmatmul.msk.f32.vlgmr.msra.gmra.mxu3 %vm110_vm0, %v100_v5 }
  0x26   :  { %742 = vmatmul.msk.f32.gmra.mxu3 %vm110_vm0, %v101_v6 }
  0x2e   :  { %743 = vmatmul.msk.f32.gmra.mxu3 %vm110_vm0, %v102_v7 }
  0x9b   :  { %v140_v10 = vpop.f32.mrf.mxu0 }
  0x9c   :  { %v141_v11 = vadd.f32 %v140_v10, %v109_v9 }
  0x9e   :  { %v156_v12 = vmul.f32 %v141_v11, %v141_v11  ;;  %v152_v29 = vmul.f32 0.5, %v141_v11 }
  0xa0   :  { %v160_v13 = vmul.f32 %v156_v12, %v141_v11 }
  0xa1   :  { %v143_v14 = vpop.f32.mrf.mxu3 }
  0xa2   :  { %v164_v15 = vmul.f32 0.044715, %v160_v13  ;;  %v144_v16 = vadd.f32 %v143_v14, %v109_v9 }
  0xa4   :  { %v168_v17 = vadd.f32 %v164_v15, %v141_v11  ;;  %v157_v18 = vmul.f32 %v144_v16, %v144_v16  ;;  %v153_v41 = vmul.f32 0.5, %v144_v16 }
  0xa6   :  { %v161_v19 = vmul.f32 %v157_v18, %v144_v16  ;;  %v172_v20 = vmul.f32 0.7978846, %v168_v17 }
  0xa8   :  { %v165_v21 = vmul.f32 0.044715, %v161_v19  ;;  %775 = vtanh.f32 %v172_v20 }
  0xa9   :  { %v146_v22 = vpop.f32.mrf.mxu3 }
  0xaa   :  { %v169_v23 = vadd.f32 %v165_v21, %v144_v16  ;;  %v147_v24 = vadd.f32 %v146_v22, %v109_v9 }
  0xac   :  { %v158_v25 = vmul.f32 %v147_v24, %v147_v24  ;;  %v173_v26 = vmul.f32 0.7978846, %v169_v23  ;;  %v154_v47 = vmul.f32 0.5, %v147_v24 }
  0xae   :  { %v776_v27 = vpop.eup %775  ;;  %v162_v28 = vmul.f32 %v158_v25, %v147_v24  ;;  %777 = vtanh.f32 %v173_v26 }
  0xaf   :  { %v180_v30 = vadd.f32 1.0, %v776_v27 }
  0xb0   :  { %v166_v31 = vmul.f32 0.044715, %v162_v28 }
  0xb1   :  { %v149_v32 = vpop.f32.mrf.mxu3  ;;  %v1031_v33 = vmul.f32 %v180_v30, %v152_v29  ;;  %v315_v30 = vperm.slane %v1028_v8, 1 }
  0xb2   :  { %v170_v34 = vadd.f32 %v166_v31, %v147_v24  ;;  %v150_v35 = vadd.f32 %v149_v32, %v109_v9  ;;  %v324_v31 = vperm.slane %v1028_v8, 2 }
  0xb3   :  { %192 = vrot.lane.b32.xlu0 %v1031_v33, %s960_s4 }
  0xb4   :  { %v778_v36 = vpop.eup %777  ;;  %v159_v37 = vmul.f32 %v150_v35, %v150_v35  ;;  %v174_v38 = vmul.f32 0.7978846, %v170_v34  ;;  %v155_v51 = vmul.f32 0.5, %v150_v35 }
  0xb5   :  { %v181_v39 = vadd.f32 1.0, %v778_v36 }
  0xb6   :  { %v163_v40 = vmul.f32 %v159_v37, %v150_v35  ;;  %779 = vtanh.f32 %v174_v38 }
  0xb7   :  { %v1035_v43 = vmul.f32 %v181_v39, %v153_v41 }
  0xb8   :  { %v167_v42 = vmul.f32 0.044715, %v163_v40 }
  0xba   :  { %v171_v44 = vadd.f32 %v167_v42, %v150_v35 }
  0xbb   :  { %194 = vrot.lane.b32.xlu0 %v1035_v43, %s960_s4 }
  0xbc   :  { %v780_v45 = vpop.eup %779  ;;  %v175_v46 = vmul.f32 0.7978846, %v171_v44 }
  0xbd   :  { %v182_v48 = vadd.f32 1.0, %v780_v45 }
  0xbe   :  { %781 = vtanh.f32 %v175_v46 }
  0xbf   :  { %v1039_v49 = vmul.f32 %v182_v48, %v154_v47  ;;  %783 = vrcp.f32 %v961_v62 }
  0xc1   :  { %196 = vrot.lane.b32.xlu1 %v1039_v49, %s960_s4 }
  0xc4   :  { %v782_v50 = vpop.eup %781 }
  0xc5   :  { %v183_v52 = vadd.f32 1.0, %v782_v50  ;;  %v784_v63 = vpop.eup %783 }
  0xc6   :  { %v217_v0 = vmul.f32 32.0, %v784_v63  ;;  %vm221_vm1 = vweird.f32 %v784_v63 }
  0xc7   :  { %v1043_v53 = vmul.f32 %v183_v52, %v155_v51 }
  0xc8   :  { %v218_v1 = vsub.f32 1.0, %v217_v0 }
  0xc9   :  { %198 = vrot.lane.b32.xlu1 %v1043_v53, %s960_s4 }
  0xca   :  { %v219_v2 = vmul.f32 %v784_v63, %v218_v1 }
  0xcc   :  { %v220_v3 = vadd.f32 %v784_v63, %v219_v2 }
  0xce   :  { %v222_v4 = vsel %vm221_vm1, %v784_v63, %v220_v3 }
 0x125   :  { %v193_v54 = vpop.permute.xlu0 %192 }
 0x126   :  { %v204_v55 = vsel %vm110_vm0, %v193_v54, 0.0 }
 0x127   :  { %205 = vadd.xlane.f32.xlu2 %v204_v55 }
 0x12d   :  { %v195_v56 = vpop.permute.xlu0 %194 }
 0x12e   :  { %v207_v57 = vsel %vm110_vm0, %v195_v56, 0.0 }
 0x12f   :  { %208 = vadd.xlane.f32.xlu2 %v207_v57 }
 0x133   :  { %v197_v58 = vpop.permute.xlu1 %196 }
 0x134   :  { %v210_v59 = vsel %vm110_vm0, %v197_v58, 0.0 }
 0x135   :  { %211 = vadd.xlane.f32.xlu0 %v210_v59 }
 0x13b   :  { %v199_v60 = vpop.permute.xlu1 %198 }
 0x13c   :  { %v213_v61 = vsel %vm110_vm0, %v199_v60, 0.0 }
 0x13d   :  { %214 = vadd.xlane.f32.xlu1 %v213_v61 }
 0x19a   :  { %v206_v5 = vpop.xlane.xlu2 %205 }
 0x19b   :  { %v223_v6 = vmul.f32 %v222_v4, %v206_v5 }
 0x19d   :  { %v1052_v7 = vsub.f32 %v1031_v33, %v223_v6 }
 0x19f   :  { %v231_v9 = vmul.f32 %v1052_v7, %v1052_v7 }
 0x1a1   :  { %239 = vrot.lane.b32.xlu2 %v231_v9, %s960_s4 }
 0x1a2   :  { %v209_v10 = vpop.xlane.xlu2 %208 }
 0x1a3   :  { %v224_v11 = vmul.f32 %v222_v4, %v209_v10 }
 0x1a5   :  { %v1058_v12 = vsub.f32 %v1035_v43, %v224_v11 }
 0x1a7   :  { %v232_v13 = vmul.f32 %v1058_v12, %v1058_v12 }
 0x1a8   :  { %v212_v14 = vpop.xlane.xlu0 %211 }
 0x1a9   :  { %v225_v15 = vmul.f32 %v222_v4, %v212_v14  ;;  %241 = vrot.lane.b32.xlu2 %v232_v13, %s960_s4 }
 0x1ab   :  { %v1064_v16 = vsub.f32 %v1039_v49, %v225_v15 }
 0x1ad   :  { %v233_v17 = vmul.f32 %v1064_v16, %v1064_v16 }
 0x1b0   :  { %v215_v18 = vpop.xlane.xlu1 %214 }
 0x1b1   :  { %v226_v19 = vmul.f32 %v222_v4, %v215_v18  ;;  %243 = vrot.lane.b32.xlu2 %v233_v17, %s960_s4 }
 0x1b3   :  { %v1070_v20 = vsub.f32 %v1043_v53, %v226_v19 }
 0x1b5   :  { %v234_v21 = vmul.f32 %v1070_v20, %v1070_v20 }
 0x1b9   :  { %245 = vrot.lane.b32.xlu2 %v234_v21, %s960_s4 }
 0x1fb   :  { %v240_v22 = vpop.permute.xlu2 %239 }
 0x1fc   :  { %v251_v23 = vsel %vm110_vm0, %v240_v22, 0.0 }
 0x1fd   :  { %252 = vadd.xlane.f32.xlu0 %v251_v23 }
 0x203   :  { %v242_v24 = vpop.permute.xlu2 %241 }
 0x204   :  { %v254_v25 = vsel %vm110_vm0, %v242_v24, 0.0 }
 0x205   :  { %255 = vadd.xlane.f32.xlu1 %v254_v25 }
 0x20b   :  { %v244_v26 = vpop.permute.xlu2 %243 }
 0x20c   :  { %v257_v27 = vsel %vm110_vm0, %v244_v26, 0.0 }
 0x20d   :  { %258 = vadd.xlane.f32.xlu2 %v257_v27 }
 0x213   :  { %v246_v28 = vpop.permute.xlu2 %245 }
 0x214   :  { %v260_v29 = vsel %vm110_vm0, %v246_v28, 0.0 }
 0x215   :  { %261 = vadd.xlane.f32.xlu0 %v260_v29 }
 0x21e   :  { %317 = vrot.lane.b32.xlu1 %v315_v30, %s962_s16 }
 0x229   :  { %326 = vrot.lane.b32.xlu0 %v324_v31, %s962_s16 }
 0x270   :  { %v253_v32 = vpop.xlane.xlu0 %252 }
 0x271   :  { %v263_v34 = vmul.f32 %v253_v32, %v222_v4  ;;  %v104_v32 = vld [vmem:[#allocation10 + $0x8] sm:$0x7] }
 0x273   :  { %v267_v35 = vadd.f32 1e-12, %v263_v34 }
 0x275   :  { %785 = vrsqrt.f32 %v267_v35  ;;  %vm277_vm6 = vweird.f32 %v267_v35 }
 0x278   :  { %v256_v36 = vpop.xlane.xlu1 %255 }
 0x279   :  { %v264_v37 = vmul.f32 %v256_v36, %v222_v4  ;;  %v1092_v36 = vperm.slane %v104_v32, 0 }
 0x27b   :  { %v268_v38 = vadd.f32 1e-12, %v264_v37  ;;  %v786_v39 = vpop.eup %785  ;;  %v1094_v37 = vperm.slane %v104_v32, 1 }
 0x27c   :  { %v272_v41 = vmul.f32 %v786_v39, %v267_v35  ;;  %vm278_vm3 = vweird.f32 %v786_v39 }
 0x27d   :  { %787 = vrsqrt.f32 %v268_v38  ;;  %vm287_vm4 = vweird.f32 %v268_v38  ;;  %vm279_vm7 = vmor %vm277_vm6, %vm278_vm3  ;;  %vm501_vm3 = vcmask 1044480  }
 0x27e   :  { %v273_v47 = vmul.f32 %v786_v39, %v272_v41 }
 0x280   :  { %v259_v40 = vpop.xlane.xlu2 %258  ;;  %v274_v52 = vmul.f32 0.5, %v273_v47 }
 0x281   :  { %v265_v42 = vmul.f32 %v259_v40, %v222_v4 }
 0x282   :  { %v275_v59 = vsub.f32 1.5, %v274_v52  ;;  %v1107_v52 = vperm.slane %v1028_v8, 7 }
 0x283   :  { %v788_v44 = vpop.eup %787  ;;  %v269_v45 = vadd.f32 1e-12, %v265_v42  ;;  %v1099_v42 = vperm.slane %v1028_v8, 3 }
 0x284   :  { %v282_v46 = vmul.f32 %v788_v44, %v268_v38  ;;  %vm288_vm2 = vweird.f32 %v788_v44  ;;  %v276_v63 = vmul.f32 %v786_v39, %v275_v59  ;;  %v1096_v38 = vperm.slane %v104_v32, 2 }
 0x285   :  { %789 = vrsqrt.f32 %v269_v45  ;;  %vm289_vm5 = vmor %vm287_vm4, %vm288_vm2  ;;  %vm297_vm9 = vweird.f32 %v269_v45  ;;  %vm536_vm4 = vcmask 1043456  }
 0x286   :  { %v283_v48 = vmul.f32 %v788_v44, %v282_v46  ;;  %v280_v5 = vsel %vm279_vm7, %v786_v39, %v276_v63 }
 0x287   :  { %v311_v13 = vmul.f32 %v280_v5, %v1052_v7 }
 0x288   :  { %v284_v50 = vmul.f32 0.5, %v283_v48  ;;  %v262_v51 = vpop.xlane.xlu0 %261 }
 0x289   :  { %v266_v54 = vmul.f32 %v262_v51, %v222_v4 }
 0x28a   :  { %v285_v56 = vsub.f32 1.5, %v284_v50 }
 0x28b   :  { %v790_v55 = vpop.eup %789  ;;  %v270_v57 = vadd.f32 1e-12, %v266_v54 }
 0x28c   :  { %v292_v58 = vmul.f32 %v790_v55, %v269_v45  ;;  %v286_v61 = vmul.f32 %v788_v44, %v285_v56  ;;  %vm298_vm8 = vweird.f32 %v790_v55 }
 0x28d   :  { %791 = vrsqrt.f32 %v270_v57  ;;  %vm299_vm10 = vmor %vm297_vm9, %vm298_vm8  ;;  %vm307_vm12 = vweird.f32 %v270_v57 }
 0x28e   :  { %v293_v60 = vmul.f32 %v790_v55, %v292_v58  ;;  %v290_v2 = vsel %vm289_vm5, %v788_v44, %v286_v61  ;;  %v1102_v44 = vperm.slane %v1028_v8, 6 }
 0x28f   :  { %v312_v9 = vmul.f32 %v290_v2, %v1058_v12 }
 0x290   :  { %v294_v62 = vmul.f32 0.5, %v293_v60  ;;  %v318_v10 = vpop.permute.xlu1 %317 }
 0x291   :  { %v320_v17 = vmul.f32 %v318_v10, %v311_v13  ;;  %v321_v18 = vmul.f32 %v318_v10, %v312_v9 }
 0x292   :  { %v295_v0 = vsub.f32 1.5, %v294_v62 }
 0x293   :  { %v792_v1 = vpop.eup %791 }
 0x294   :  { %v302_v3 = vmul.f32 %v792_v1, %v270_v57  ;;  %v296_v4 = vmul.f32 %v790_v55, %v295_v0  ;;  %vm308_vm11 = vweird.f32 %v792_v1 }
 0x295   :  { %vm309_vm13 = vmor %vm307_vm12, %vm308_vm11 }
 0x296   :  { %v303_v6 = vmul.f32 %v792_v1, %v302_v3  ;;  %v300_v14 = vsel %vm299_vm10, %v790_v55, %v296_v4 }
 0x297   :  { %v313_v22 = vmul.f32 %v300_v14, %v1064_v16  ;;  %v372_v16 = vlaneseq }
 0x298   :  { %v304_v11 = vmul.f32 0.5, %v303_v6 }
 0x299   :  { %v322_v25 = vmul.f32 %v318_v10, %v313_v22  ;;  %v373_v29 = vshrl.u32 %v372_v16, 7 }
 0x29a   :  { %v305_v15 = vsub.f32 1.5, %v304_v11 }
 0x29b   :  { %v327_v19 = vpop.permute.xlu0 %326  ;;  %v375_v30 = vadd.s32 16, %v373_v29  ;;  %v381_v31 = vand.u32 15, %v373_v29  ;;  %v374_v35 = vadd.s32 8, %v373_v29  ;;  %v376_v40 = vadd.s32 24, %v373_v29 }
 0x29c   :  { %v306_v21 = vmul.f32 %v792_v1, %v305_v15  ;;  %v330_v23 = vadd.f32 %v327_v19, %v321_v18  ;;  %v329_v24 = vadd.f32 %v327_v19, %v320_v17  ;;  %v1087_v28 = vadd.f32 %v327_v19, %v322_v25 }
 0x29d   :  { %v395_v34 = vand.u32 15, %v375_v30  ;;  %v447_v39 = vadd.s32 4294967295, %v381_v31  ;;  %v388_v50 = vand.u32 15, %v374_v35  ;;  %v402_v55 = vand.u32 15, %v376_v40 }
 0x29e   :  { %v310_v12 = vsel %vm309_vm13, %v792_v1, %v306_v21  ;;  %339 = vrot.lane.b32.xlu0 %v330_v23, %s960_s4  ;;  %337 = vrot.lane.b32.xlu1 %v329_v24, %s960_s4 }
 0x29f   :  { %v314_v7 = vmul.f32 %v310_v12, %v1070_v20  ;;  %v426_v20 = vadd.s32 4294967294, %v381_v31  ;;  %v428_v46 = vadd.s32 4294967294, %v395_v34  ;;  %vm451_vm2 = vcmp.ge.s32.totalorder %v447_v39, 0 }
 0x2a0   :  { %v449_v58 = vadd.s32 4294967295, %v395_v34  ;;  %v1114_v62 = vadd.s32 1, %v388_v50  ;;  %v496_v5 = vadd.s32 1, %v402_v55  ;;  %v1120_v6 = vadd.s32 2, %v388_v50 }
 0x2a1   :  { %v323_v26 = vmul.f32 %v318_v10, %v314_v7  ;;  %vm430_vm1 = vcmp.ge.s32.totalorder %v426_v20, 0  ;;  %vm432_vm5 = vcmp.ge.s32.totalorder %v428_v46, 0  ;;  %v1126_v14 = vadd.s32 2, %v402_v55 }
 0x2a2   :  { %vm453_vm6 = vcmp.ge.s32.totalorder %v449_v58, 0  ;;  %vm498_vm7 = vcmp.lt.s32.totalorder %v1114_v62, 16  ;;  %vm500_vm8 = vcmp.lt.s32.totalorder %v496_v5, 16  ;;  %vm533_vm9 = vcmp.lt.s32.totalorder %v1120_v6, 16 }
 0x2a3   :  { %v332_v27 = vadd.f32 %v327_v19, %v323_v26  ;;  %vm535_vm10 = vcmp.lt.s32.totalorder %v1126_v14, 16 }
 0x2a6   :  { %343 = vrot.lane.b32.xlu0 %v332_v27, %s960_s4  ;;  %341 = vrot.lane.b32.xlu1 %v1087_v28, %s960_s4 }
 0x310   :  { %v340_v41 = vpop.permute.xlu0 %339  ;;  %v338_v45 = vpop.permute.xlu1 %337 }
 0x311   :  { %v350_v47 = vsel %vm110_vm0, %v340_v41, %v330_v23  ;;  %v349_v48 = vsel %vm110_vm0, %v338_v45, %v329_v24 }
 0x312   :  { %v359_v51 = vrot.slane %v350_v47, 6  ;;  %v358_v54 = vrot.slane %v349_v48, 6  ;;  %v485_v12 = vmul.f32 %v1092_v36, %v349_v48  ;;  %v486_v25 = vmul.f32 %v1092_v36, %v350_v47 }
 0x314   :  { %v1110_v56 = vsel %vm357_vm14, %v358_v54, %v359_v51  ;;  %v370_v57 = vsel %vm357_vm14, 0.0, %v358_v54 }
 0x315   :  { %v434_v59 = vsel %vm430_vm1, %v370_v57, 0.0  ;;  %v458_v60 = vrot.slane %v370_v57, 1  ;;  %v459_v61 = vrot.slane %v1110_v56, 1  ;;  %v502_v0 = vrot.slane %v370_v57, 3 }
 0x316   :  { %v439_v63 = vmul.f32 %v1102_v44, %v434_v59  ;;  %v503_v1 = vrot.slane %v1110_v56, 3  ;;  %v537_v2 = vrot.slane %v370_v57, 4  ;;  %v538_v4 = vrot.slane %v1110_v56, 4 }
 0x317   :  { %v460_v3 = vsel %vm457_vm15, %v458_v60, %v459_v61  ;;  %v440_v9 = vmul.f32 %v1102_v44, %v1110_v56 }
 0x318   :  { %v443_v10 = vadd.f32 %v439_v63, %v1099_v42  ;;  %v471_v11 = vsel %vm451_vm2, %v460_v3, 0.0  ;;  %v344_v13 = vpop.permute.xlu0 %343  ;;  %v342_v15 = vpop.permute.xlu1 %341  ;;  %v504_v19 = vsel %vm501_vm3, %v502_v0, %v503_v1  ;;  %v539_v21 = vsel %vm536_vm4, %v537_v2, %v538_v4 }
 0x319   :  { %v476_v17 = vmul.f32 %v1107_v52, %v471_v11  ;;  %v352_v18 = vsel %vm110_vm0, %v344_v13, %v332_v27  ;;  %v351_v23 = vsel %vm110_vm0, %v342_v15, %v1087_v28  ;;  %v444_v26 = vadd.f32 %v440_v9, %v1099_v42 }
 0x31a   :  { %v363_v22 = vrot.slane %v352_v18, 6  ;;  %v361_v7 = vrot.slane %v351_v23, 6  ;;  %v520_v29 = vmul.f32 %v1094_v37, %v504_v19  ;;  %v555_v30 = vmul.f32 %v1096_v38, %v539_v21 }
 0x31b   :  { %v480_v24 = vadd.f32 %v476_v17, %v443_v10  ;;  %v488_v28 = vmul.f32 %v1092_v36, %v352_v18  ;;  %v487_v35 = vmul.f32 %v1092_v36, %v351_v23 }
 0x31c   :  { %v371_v27 = vsel %vm357_vm14, %v363_v22, 0.0  ;;  %v362_v32 = vsel %vm357_vm14, %v359_v51, %v361_v7  ;;  %v364_v34 = vsel %vm357_vm14, %v361_v7, %v363_v22 }
 0x31d   :  { %v489_v16 = vadd.f32 %v485_v12, %v480_v24  ;;  %v465_v31 = vrot.slane %v371_v27, 1  ;;  %v509_v20 = vrot.slane %v371_v27, 3  ;;  %v436_v39 = vsel %vm432_vm5, %v362_v32, 0.0 }
 0x31e   :  { %v442_v40 = vmul.f32 %v1102_v44, %v364_v34  ;;  %v461_v41 = vrot.slane %v362_v32, 1  ;;  %v441_v45 = vmul.f32 %v1102_v44, %v436_v39  ;;  %v463_v47 = vrot.slane %v364_v34, 1 }
 0x31f   :  { %v505_v48 = vrot.slane %v362_v32, 3  ;;  %v507_v50 = vrot.slane %v364_v34, 3  ;;  %v524_v54 = vadd.f32 %v520_v29, %v489_v16  ;;  %v540_v57 = vrot.slane %v362_v32, 4 }
 0x320   :  { %v446_v55 = vadd.f32 %v442_v40, %v1099_v42  ;;  %v462_v51 = vsel %vm457_vm15, %v459_v61, %v461_v41  ;;  %v445_v59 = vadd.f32 %v441_v45, %v1099_v42  ;;  %v464_v36 = vsel %vm457_vm15, %v461_v41, %v463_v47 }
 0x321   :  { %v466_v46 = vsel %vm457_vm15, %v463_v47, %v465_v31  ;;  %v477_v60 = vmul.f32 %v1107_v52, %v462_v51  ;;  %v544_v63 = vrot.slane %v371_v27, 4  ;;  %v473_v44 = vsel %vm453_vm6, %v464_v36, 0.0 }
 0x322   :  { %v479_v0 = vmul.f32 %v1107_v52, %v466_v46  ;;  %v506_v2 = vsel %vm501_vm3, %v503_v1, %v505_v48  ;;  %v478_v3 = vmul.f32 %v1107_v52, %v473_v44  ;;  %v510_v61 = vsel %vm501_vm3, %v507_v50, %v509_v20 }
 0x323   :  { %v481_v9 = vadd.f32 %v477_v60, %v444_v26  ;;  %v516_v42 = vsel %vm498_vm7, %v506_v2, 0.0  ;;  %v1165_v10 = vadd.f32 %v555_v30, %v524_v54  ;;  %v508_v13 = vsel %vm501_vm3, %v505_v48, %v507_v50  ;;  %v622_v30 = vld [vmem:[#allocation7 + $0x18] sm:$0xff] }
 0x324   :  { %v483_v11 = vadd.f32 %v479_v0, %v446_v55  ;;  %v518_v58 = vsel %vm500_vm8, %v510_v61, 0.0  ;;  %v482_v15 = vadd.f32 %v478_v3, %v445_v59  ;;  %v521_v17 = vmul.f32 %v1094_v37, %v516_v42  ;;  %756 = vmatpush.msra.mxu1 %v622_v30  ;;  %648 = vmatpush.msrb.mxu0 %v622_v30 }
 0x325   :  { %v541_v52 = vsel %vm536_vm4, %v538_v4, %v540_v57  ;;  %v542_v1 = vrot.slane %v364_v34, 4  ;;  %v523_v19 = vmul.f32 %v1094_v37, %v518_v58  ;;  %v490_v21 = vadd.f32 %v486_v25, %v481_v9 }
 0x326   :  { %v492_v18 = vadd.f32 %v488_v28, %v483_v11  ;;  %v551_v62 = vsel %vm533_vm9, %v541_v52, 0.0  ;;  %v491_v22 = vadd.f32 %v487_v35, %v482_v15  ;;  %v522_v23 = vmul.f32 %v1094_v37, %v508_v13  ;;  %v621_v28 = vld [vmem:[#allocation7 + $0x10] sm:$0xff]  ;;  %v620_v35 = vld [vmem:[#allocation7 + $0x8] sm:$0xff] }
 0x327   :  { %v543_v5 = vsel %vm536_vm4, %v540_v57, %v542_v1  ;;  %v545_v24 = vsel %vm536_vm4, %v542_v1, %v544_v63  ;;  %v525_v4 = vadd.f32 %v521_v17, %v490_v21  ;;  %v556_v7 = vmul.f32 %v1096_v38, %v551_v62  ;;  %757 = vmatpush.msra.mxu1 %v621_v28  ;;  %v619_v1 = vld [vmem:[#allocation7] sm:$0xff]  ;;  %v672_v62 = vld [vmem:[#allocation8 + $0x18] sm:$0xff] }
 0x328   :  { %v553_v56 = vsel %vm535_vm10, %v545_v24, 0.0  ;;  %v527_v12 = vadd.f32 %v523_v19, %v492_v18  ;;  %v526_v26 = vadd.f32 %v522_v23, %v491_v22  ;;  %v557_v27 = vmul.f32 %v1096_v38, %v543_v5  ;;  %649 = vmatpush.msrb.mxu0 %v621_v28  ;;  %760 = vmatpush.msra.mxu2 %v672_v62 }
 0x329   :  { %v558_v6 = vmul.f32 %v1096_v38, %v553_v56  ;;  %v567_v25 = vmul.f32 %v1165_v10, %v1165_v10  ;;  %v560_v37 = vadd.f32 %v556_v7, %v525_v4  ;;  %758 = vmatpush.msra.mxu1 %v620_v35  ;;  %v563_v17 = vmul.f32 0.5, %v1165_v10  ;;  %v671_v56 = vld [vmem:[#allocation8 + $0x10] sm:$0xff]  ;;  %v669_v4 = vld [vmem:[#allocation8] sm:$0xff] }
 0x32a   :  { %v561_v16 = vadd.f32 %v557_v27, %v526_v26  ;;  %650 = vmatpush.msrb.mxu0 %v620_v35  ;;  %761 = vmatpush.msra.mxu2 %v671_v56  ;;  %v623_v7 = vperm.slane %v1028_v8, 4 }
 0x32b   :  { %v562_v29 = vadd.f32 %v558_v6, %v527_v12  ;;  %v568_v31 = vmul.f32 %v560_v37, %v560_v37  ;;  %v571_v14 = vmul.f32 %v567_v25, %v1165_v10  ;;  %v564_v63 = vmul.f32 0.5, %v560_v37  ;;  %759 = vmatpush.msra.mxu1 %v619_v1  ;;  %v670_v12 = vld [vmem:[#allocation8 + $0x8] sm:$0xff] }
 0x32c   :  { %v569_v34 = vmul.f32 %v561_v16, %v561_v16  ;;  %v565_v61 = vmul.f32 0.5, %v561_v16  ;;  %651 = vmatpush.msrb.mxu0 %v619_v1  ;;  %762 = vmatpush.msra.mxu2 %v670_v12 }
 0x32d   :  { %v570_v32 = vmul.f32 %v562_v29, %v562_v29  ;;  %v572_v20 = vmul.f32 %v568_v31, %v560_v37  ;;  %v575_v41 = vmul.f32 0.044715, %v571_v14  ;;  %v566_v2 = vmul.f32 0.5, %v562_v29 }
 0x32e   :  { %v573_v39 = vmul.f32 %v569_v34, %v561_v16  ;;  %698 = vmatpush.msra.mxu0 %v672_v62  ;;  %763 = vmatpush.msra.mxu2 %v669_v4 }
 0x32f   :  { %v574_v38 = vmul.f32 %v570_v32, %v562_v29  ;;  %v576_v40 = vmul.f32 0.044715, %v572_v20  ;;  %v579_v51 = vadd.f32 %v575_v41, %v1165_v10 }
 0x330   :  { %v577_v47 = vmul.f32 0.044715, %v573_v39  ;;  %699 = vmatpush.msra.mxu0 %v671_v56 }
 0x331   :  { %v578_v45 = vmul.f32 0.044715, %v574_v38  ;;  %v580_v48 = vadd.f32 %v576_v40, %v560_v37  ;;  %v583_v36 = vmul.f32 0.7978846, %v579_v51 }
 0x332   :  { %v581_v54 = vadd.f32 %v577_v47, %v561_v16  ;;  %700 = vmatpush.msra.mxu0 %v670_v12 }
 0x333   :  { %v582_v50 = vadd.f32 %v578_v45, %v562_v29  ;;  %v584_v55 = vmul.f32 0.7978846, %v580_v48 }
 0x334   :  { %v585_v59 = vmul.f32 0.7978846, %v581_v54  ;;  %701 = vmatpush.msra.mxu0 %v669_v4 }
 0x335   :  { %v586_v57 = vmul.f32 0.7978846, %v582_v50  ;;  %793 = vtanh.f32 %v584_v55 }
 0x337   :  { %795 = vtanh.f32 %v586_v57 }
 0x338   :  { %797 = vtanh.f32 %v585_v59 }
 0x339   :  { %799 = vtanh.f32 %v583_v36 }
 0x33b   :  { %v794_v46 = vpop.eup %793 }
 0x33c   :  { %v592_v44 = vadd.f32 1.0, %v794_v46 }
 0x33d   :  { %v796_v60 = vpop.eup %795 }
 0x33e   :  { %v798_v0 = vpop.eup %797  ;;  %v594_v3 = vadd.f32 1.0, %v796_v60  ;;  %v596_v9 = vmul.f32 %v592_v44, %v564_v63 }
 0x33f   :  { %v593_v42 = vadd.f32 1.0, %v798_v0  ;;  %v800_v58 = vpop.eup %799 }
 0x340   :  { %v598_v11 = vmul.f32 %v594_v3, %v566_v2  ;;  %605 = vrot.lane.b32.xlu2 %v596_v9, %s960_s4  ;;  %v591_v15 = vadd.f32 1.0, %v800_v58 }
 0x341   :  { %v597_v13 = vmul.f32 %v593_v42, %v565_v61 }
 0x342   :  { %609 = vrot.lane.b32.xlu0 %v598_v11, %s960_s4  ;;  %v595_v52 = vmul.f32 %v591_v15, %v563_v17 }
 0x343   :  { %607 = vrot.lane.b32.xlu1 %v597_v13, %s960_s4 }
 0x34b   :  { %603 = vrot.lane.b32.xlu1 %v595_v52, %s960_s4 }
 0x39a   :  { %v606_v18 = vpop.permute.xlu2 %605 }
 0x39b   :  { %v616_v19 = vadd.f32 %v606_v18, %v596_v9 }
 0x39d   :  { %745 = vmatmul.msk.f32.vlgmr.msra.gmra.mxu1 %vm110_vm0, %v616_v19 }
 0x3b4   :  { %v610_v23 = vpop.permute.xlu0 %609 }
 0x3b5   :  { %v608_v21 = vpop.permute.xlu1 %607  ;;  %v618_v10 = vadd.f32 %v610_v23, %v598_v11 }
 0x3b6   :  { %v617_v22 = vadd.f32 %v608_v21, %v597_v13 }
 0x3b8   :  { %746 = vmatmul.msk.f32.gmra.mxu1 %vm110_vm0, %v617_v22 }
 0x3bd   :  { %v604_v5 = vpop.permute.xlu1 %603 }
 0x3be   :  { %v615_v24 = vadd.f32 %v604_v5, %v595_v52 }
 0x3c0   :  { %744 = vmatmul.msk.f32.vlgmr.msrb.gmra.mxu0 %vm110_vm0, %v615_v24  ;;  %747 = vmatmul.msk.f32.gmra.mxu1 %vm110_vm0, %v618_v10 }
 0x41a   :  { %v656_v26 = vpop.f32.mrf.mxu1 }
 0x41b   :  { %v657_v27 = vadd.f32 %v656_v26, %v623_v7 }
 0x41d   :  { %v666_v6 = vmul.f32 %v657_v27, %v1035_v43  ;;  %v673_v43 = vperm.slane %v1028_v8, 5 }
 0x41f   :  { %749 = vmatmul.msk.f32.vlgmr.msra.gmra.mxu2 %vm110_vm0, %v666_v6 }
 0x435   :  { %v659_v25 = vpop.f32.mrf.mxu1 }
 0x436   :  { %v660_v37 = vadd.f32 %v659_v25, %v623_v7 }
 0x438   :  { %v667_v16 = vmul.f32 %v660_v37, %v1039_v49 }
 0x43a   :  { %750 = vmatmul.msk.f32.gmra.mxu2 %vm110_vm0, %v667_v16 }
 0x43d   :  { %v653_v29 = vpop.f32.mrf.mxu0  ;;  %v662_v30 = vpop.f32.mrf.mxu1 }
 0x43e   :  { %v654_v28 = vadd.f32 %v653_v29, %v623_v7  ;;  %v663_v31 = vadd.f32 %v662_v30, %v623_v7 }
 0x440   :  { %v665_v14 = vmul.f32 %v654_v28, %v1031_v33  ;;  %v668_v32 = vmul.f32 %v663_v31, %v1043_v53 }
 0x442   :  { %748 = vmatmul.msk.f32.vlgmr.msra.gmra.mxu0 %vm110_vm0, %v665_v14  ;;  %751 = vmatmul.msk.f32.gmra.mxu2 %vm110_vm0, %v668_v32 }
 0x4a2   :  { %v706_v34 = vpop.f32.mrf.mxu2 }
 0x4a3   :  { %v707_v35 = vadd.f32 %v706_v34, %v673_v43 }
 0x4a5   :  { %716 = vst.msk [vmem:[#allocation11 + $0x8] sm:$0xff] %vm110_vm0, %v707_v35 }
 0x4bd   :  { %v709_v49 = vpop.f32.mrf.mxu2 }
 0x4be   :  { %v710_v20 = vadd.f32 %v709_v49, %v673_v43 }
 0x4bf   :  { %v703_v38 = vpop.f32.mrf.mxu0 }
 0x4c0   :  { %717 = vst.msk [vmem:[#allocation11 + $0x10] sm:$0xff] %vm110_vm0, %v710_v20  ;;  %v704_v39 = vadd.f32 %v703_v38, %v673_v43 }
 0x4c2   :  { %715 = vst.msk [vmem:[#allocation11] sm:$0xff] %vm110_vm0, %v704_v39 }
 0x4c5   :  { %v712_v33 = vpop.f32.mrf.mxu2 }
 0x4c6   :  { %v713_v8 = vadd.f32 %v712_v33, %v673_v43 }
 0x4c8   :  { %718 = vst.msk [vmem:[#allocation11 + $0x18] sm:$0xff] %vm110_vm0, %v713_v8 }
 0x4c9   :  { %731 = dma.vmem_to_hbm [thread:$0]  %s724_s18, 512, %s726_s21, [#allocation4], %s954_s26, %s954_s26, %s955_s27  }
 0x4ca   :  { %951 = dma.done.wait [#allocation4], 512  }
 0x4cb   :  { %952 = vsyncadd [#allocation4], 4294966784 }
 0x4cc   :  { %736 = vsyncpa [#allocation3], 1 }
 0x4cd   :  { %737 = vsyncpa [#allocation6], 1 }
 0x4ce   :  { %738 = vsyncpa [#allocation9], 1 }
 0x4cf   :  { %739 = vsyncpa [#allocation4], 1 }

</bundles_post_ra>
